<compile_context>
chip_gen: v7x
topology: tpu7x:2x2x1
jax: 0.10.0
libtpu: 0.0.40
codegen_flags: <defaults>
</compile_context>

<pallas_src>
import functools

import jax
import jax.numpy as jnp
from jax.experimental import pallas as pl
from jax.experimental.pallas import tpu as pltpu


def _block2channel_copy_kernel(x_ref, o_ref, *, bh, th, row):
    """Pure data-movement body: statically unrolled, lane-aligned slab copies.

    x_ref: (tb, th*bh, Wo, row)     -- th*bh contiguous input rows, all tb batches
    o_ref: (tb, th,    Wo, bh*row)  -- th output rows, full channel extent (lane-dense)

    Output channel segment ib (width `row`) of output row t is exactly input
    row t*bh + ib.  One assignment moves a (tb, Wo, row) slab, so the unrolled
    copy count is th*bh regardless of how many batches are folded into a block.
    """
    for t in range(th):
        for ib in range(bh):
            o_ref[:, t, :, ib * row:(ib + 1) * row] = x_ref[:, t * bh + ib, :, :]


def _divisors(n):
    return [d for d in range(1, n + 1) if n % d == 0]


def _choose_tiling(B, Ho, Wo, bh, out_row, itemsize, *, target_block_bytes,
                   max_unrolled_copies, min_grid_steps):
    """Pick (tb, th) maximizing block bytes under VMEM / occupancy / unroll caps."""
    wo_pad = ((Wo + 7) // 8) * 8                  # sublane padding of each slab
    slab_bytes = wo_pad * out_row * itemsize      # one output row's VMEM footprint
    min_steps = min(min_grid_steps, B * Ho)

    best_tb, best_th = 1, 1
    best_bytes = slab_bytes
    for tb in _divisors(B):
        for th in _divisors(Ho):
            if th * bh > max_unrolled_copies:
                continue
            if (B // tb) * (Ho // th) < min_steps:
                continue
            blk = tb * th * slab_bytes
            if blk > target_block_bytes:
                continue
            # Prefer bigger blocks; on ties prefer batch folding (fewer copies).
            if blk > best_bytes or (blk == best_bytes and tb > best_tb):
                best_tb, best_th, best_bytes = tb, th, blk
    return best_tb, best_th, best_bytes


def block2channel_3d(x, block_shape, *, target_block_bytes=4 << 20,
                     max_unrolled_copies=64, min_grid_steps=8):
    """Pallas equivalent of Block2Channel3d.forward.

    x: (B, H, W, C, P, Q)  ->  (B, H//bh, W//bw, C*bh*bw, P, Q)
    Merged channel ordering is (bh, bw, C) row-major, matching the PyTorch
    reshape/permute semantics.
    """
    bh, bw = block_shape[0], block_shape[-1]
    B, H, W, C, P, Q = x.shape
    assert H % bh == 0 and W % bw == 0, "block shape must divide spatial dims"
    Ho, Wo = H // bh, W // bw
    M = C * P * Q
    row = bw * M          # one input row of the reshaped view
    out_row = bh * row    # one full output row (full channel extent -> lane-dense)

    # Free, contiguity-preserving view: (B, H, Wo, bw*M).
    x_r = x.reshape(B, H, Wo, row)

    itemsize = jnp.dtype(x.dtype).itemsize
    tb, th, block_bytes = _choose_tiling(
        B, Ho, Wo, bh, out_row, itemsize,
        target_block_bytes=target_block_bytes,
        max_unrolled_copies=max_unrolled_copies,
        min_grid_steps=min_grid_steps)

    # Double-buffered input + output ~= 4x block bytes; add headroom, keep the
    # scoped-VMEM request well under v7x's 64 MiB physical per-TC budget.
    vmem_limit = int(min(48 << 20, max(32 << 20, 4 * block_bytes + (8 << 20))))

    kernel = functools.partial(_block2channel_copy_kernel, bh=bh, th=th, row=row)
    total_bytes = 2 * int(x.size) * itemsize  # read everything once, write once

    out_flat = pl.pallas_call(
        kernel,
        out_shape=jax.ShapeDtypeStruct((B, Ho, Wo, out_row), x.dtype),
        grid=(B // tb, Ho // th),
        in_specs=[
            # Last two dims are the full extent of x_r -> no (8,128) constraint.
            pl.BlockSpec((tb, th * bh, Wo, row), lambda b, g: (b, g, 0, 0)),
        ],
        # Output last dim is the full channel extent -> unmasked lane-dense stores
        # whenever row % 128 == 0.
        out_specs=pl.BlockSpec((tb, th, Wo, out_row), lambda b, g: (b, g, 0, 0)),
        compiler_params=pltpu.CompilerParams(
            # No reduction anywhere: both grid axes independent -> megacore-friendly.
            dimension_semantics=("parallel", "parallel"),
            vmem_limit_bytes=vmem_limit,
        ),
        cost_estimate=pl.CostEstimate(
            flops=0, transcendentals=0, bytes_accessed=total_bytes),
    )(x_r)

    return out_flat.reshape(B, Ho, Wo, C * bh * bw, P, Q)


def _reference_block2channel_3d(x, block_shape):
    """Pure-JAX transcription of the PyTorch forward (for verification)."""
    bh, bw = block_shape[0], block_shape[-1]
    B, H, W = x.shape[0], x.shape[1], x.shape[2]
    rest = x.shape[3:]
    y = x.reshape(B, H // bh, bh, W // bw, bw, *rest)
    y = jnp.transpose(y, (0, 1, 3, 2, 4, 5, 6, 7))
    y = y.reshape(B, H // bh, W // bw, rest[0] * bh * bw, *rest[1:])
    return y


if __name__ == "__main__":
    key = jax.random.PRNGKey(0)
    # (batch=2, H=16, W=16, num_caps=4, 4, 4), block_shape=(2, 2)
    B, H, W, C = 2, 16, 16, 4
    block_shape = (2, 2)
    x = jax.random.normal(key, (B, H, W, C, 4, 4), dtype=jnp.float32)

    out = block2channel_3d(x, block_shape)
    out = jax.block_until_ready(out)

    ref = _reference_block2channel_3d(x, block_shape)
    assert out.shape == (B, H // 2, W // 2, C * 4, 4, 4), out.shape
    assert out.dtype == x.dtype
    assert jnp.array_equal(out, ref), "mismatch vs reference"

    print("KERNEL_OK")
</pallas_src>

<mosaic_0001>
module attributes {stable_mosaic.version = 11 : i64} {
  func.func @_block2channel_copy_kernel(%arg0: i32, %arg1: i32, %arg2: memref<2x2x8x128xf32, #tpu.memory_space<vmem>>, %arg3: memref<2x1x8x256xf32, #tpu.memory_space<vmem>>) attributes {dimension_semantics = [#tpu.dimension_semantics<parallel>, #tpu.dimension_semantics<parallel>], iteration_bounds = array<i64: 1, 8>, scalar_prefetch = 0 : i64, scratch_operands = 0 : i64, tpu.core_type = #tpu.core_type<tc>, window_params = [{transform_indices = @transform_0, window_bounds = array<i64: 2, 2, 8, 128>}, {transform_indices = @transform_1, window_bounds = array<i64: 2, 1, 8, 256>}]} {
    %c0 = arith.constant 0 : index
    %c0_0 = arith.constant 0 : index
    %c0_1 = arith.constant 0 : index
    %c0_2 = arith.constant 0 : index
    %0 = vector.load %arg2[%c0, %c0_0, %c0_1, %c0_2] : memref<2x2x8x128xf32, #tpu.memory_space<vmem>>, vector<2x1x8x128xf32>
    %1 = vector.shape_cast %0 : vector<2x1x8x128xf32> to vector<2x8x128xf32>
    %c0_3 = arith.constant 0 : index
    %c0_4 = arith.constant 0 : index
    %c0_5 = arith.constant 0 : index
    %c0_6 = arith.constant 0 : index
    %2 = vector.load %arg3[%c0_3, %c0_4, %c0_5, %c0_6] : memref<2x1x8x256xf32, #tpu.memory_space<vmem>>, vector<2x1x8x128xf32>
    %3 = vector.shape_cast %2 : vector<2x1x8x128xf32> to vector<2x8x128xf32>
    %4 = vector.shape_cast %1 : vector<2x8x128xf32> to vector<2x1x8x128xf32>
    tpu.vector_store %arg3[%c0_3, %c0_4, %c0_5, %c0_6], %4 {strides = array<i32>} : memref<2x1x8x256xf32, #tpu.memory_space<vmem>>, vector<2x1x8x128xf32>,
    %c0_7 = arith.constant 0 : index
    %c1 = arith.constant 1 : index
    %c0_8 = arith.constant 0 : index
    %c0_9 = arith.constant 0 : index
    %5 = vector.load %arg2[%c0_7, %c1, %c0_8, %c0_9] : memref<2x2x8x128xf32, #tpu.memory_space<vmem>>, vector<2x1x8x128xf32>
    %6 = vector.shape_cast %5 : vector<2x1x8x128xf32> to vector<2x8x128xf32>
    %c0_10 = arith.constant 0 : index
    %c0_11 = arith.constant 0 : index
    %c0_12 = arith.constant 0 : index
    %c128 = arith.constant 128 : index
    %7 = vector.load %arg3[%c0_10, %c0_11, %c0_12, %c128] : memref<2x1x8x256xf32, #tpu.memory_space<vmem>>, vector<2x1x8x128xf32>
    %8 = vector.shape_cast %7 : vector<2x1x8x128xf32> to vector<2x8x128xf32>
    %9 = vector.shape_cast %6 : vector<2x8x128xf32> to vector<2x1x8x128xf32>
    tpu.vector_store %arg3[%c0_10, %c0_11, %c0_12, %c128], %9 {strides = array<i32>} : memref<2x1x8x256xf32, #tpu.memory_space<vmem>>, vector<2x1x8x128xf32>,
    return
  }
  func.func @transform_0(%arg0: i32, %arg1: i32) -> (i32, i32, i32, i32) {
    %c0_i32 = arith.constant 0 : i32
    %c0_i32_0 = arith.constant 0 : i32
    %c0_i32_1 = arith.constant 0 : i32
    return %arg0, %arg1, %c0_i32, %c0_i32_0 : i32, i32, i32, i32
  }
  func.func @transform_1(%arg0: i32, %arg1: i32) -> (i32, i32, i32, i32) {
    %c0_i32 = arith.constant 0 : i32
    %c0_i32_0 = arith.constant 0 : i32
    %c0_i32_1 = arith.constant 0 : i32
    return %arg0, %arg1, %c0_i32, %c0_i32_0 : i32, i32, i32, i32
  }
}

</mosaic_0001>

<bundles_post_ra>
// kernel: tpu_custom_call.1
= control target key start
LH: loop header
LB: loop body
LE: loop exit
PB: predicated region body
PF: predicated region fallthrough
CT: control target
= control target key end

     0   :  { %6 = vsyncpa [#allocation3], 0  ;;  %s642_s0 = inlined_call_operand.hbm [shape: f32[2,16,8,128], index: 0, kind: input, shape index: {}]   ;;  %s643_s1 = inlined_call_operand.hbm [shape: f32[2,8,8,256], index: 1, kind: output, shape index: {}]  }
   0x1   :  { %8 = vsyncpa [#allocation3 + $0x1], 0 }
   0x2   :  { %9 = vsyncpa [#allocation4], 0 }
   0x3   :  { %11 = vsyncpa [#allocation4 + $0x1], 0  ;;  %s493_s6 = smov 0   ;;  %s495_s7 = smov 0  }
   0x4   :  { %s497_s8 = smov 0   ;;  %s499_s9 = smov 0  }
   0x5   :  { %s501_s10 = smov 0   ;;  %s503_s11 = smov 0  }
   0x6 LB: > { %s295_s12 = sadd.s32 4294967295, %s471_s11   ;;  %s296_s13 = sadd.s32 4294967294, %s471_s11   ;;  %s471_s11 = sphi %s503_s11, %s17_s11   ;;  %s467_s10 = sphi %s501_s10, %s652_s10   ;;  %s463_s9 = sphi %s499_s9, %s651_s9   ;;  %s459_s8 = sphi %s497_s8, %s650_s8   ;;  %s455_s7 = sphi %s495_s7, %s649_s7   ;;  %s451_s6 = sphi %s493_s6, %s648_s6  }
   0x7   : > { %s26_s14 = sadd.s32 1, %s467_s10  ;;  %s38_s15 = sadd.s32 1, %s459_s8 }
   0x8   : > { %p27_p0 = scmp.ge.s32.totalorder %s26_s14, 8  ;;  %p45_p1 = scmp.ne.s32.totalorder %s459_s8, %s455_s7 }
   0x9   : > { %p46_p2 = scmp.eq.s32.totalorder %s471_s11, 0  ;;  %p51_p3 = scmp.ne.s32.totalorder %s455_s7, %s451_s6 }
   0xa   : > { %s654_s14 = smov (%p27_p0, %s26_s14), 0  ;;  %p52_p5 = scmp.eq.s32.totalorder %s295_s12, 0 }
   0xb   : > { %p534_p4 = por %p46_p2, %p45_p1  ;;  %s34_s17 = ssub.s32 %s467_s10, %s654_s14 }
   0xc   : > { %p77_p6 = scmp.eq.s32.totalorder %s295_s12, 7  ;;  %p36_p7 = scmp.eq.s32.totalorder %s34_s17, 0 }
   0xd   : > { %p540_p8 = por %p52_p5, %p51_p3  ;;  %p83_p10 = scmp.eq.s32.totalorder %s296_s13, 7 }
   0xe   : > { %p544_p9 = por %p77_p6, %p45_p1  ;;  %p298_p12 = scmp.ge.s32.totalorder %s471_s11, 8 }
   0xf   : > { %s549_s20 = scalar_select %p36_p7, %s459_s8, %s38_s15  }
  0x10   : > { %p551_p11 = por %p83_p10, %p51_p3  ;;  %99 = sbr.rel (%p298_p12) target bundleno = 36 (0x24), region = 16 }
  0x17   : > { %s103_s22 = sand.u32 1, %s459_s8   ;;  %s314_s23 = sshll.u32 %s467_s10, 8 }
  0x18   : > { %s299_s24 = sshll.u32 %s103_s22, 5  ;;  %s116_s27 = scalar_lea.hbm %s642_s0, %s314_s23 }
  0x19   : > { %s316_s28 = scalar_select %p534_p4, [#allocation0], [#allocation8] }
  0x1a   : > { %s107_s29 = scalar_lea.vmem [#allocation2], %s299_s24  ;;  %s473_s3 = smov 2048  }
  0x1b   : > { %s129_s30 = sshll.u32 %s107_s29, 4  ;;  %s121_s2 = sld [smem:[%s316_s28]]   ;;  %s130_s30 = int_to_ptr.vmem [resolvable:$true] %s129_s30 }
  0x1c   : > { %317 = sst [smem:[#allocation7]] (%p534_p4), %s473_s3  ;;  %s474_s4 = smov 256  }
  0x1d   : > { %318 = sst [smem:[#allocation7 + $0x1]] (%p534_p4), %s474_s4  ;;  %s475_s5 = smov 2  }
  0x1e   : > { %319 = sst [smem:[#allocation7 + $0x2]] (%p534_p4), %s475_s5  ;;  %s476_s12 = smov 128  }
  0x1f   : > { %320 = sst [smem:[#allocation7 + $0x3]] (%p534_p4), %s476_s12  ;;  %s477_s15 = smov 8  }
  0x20   : > { %321 = sst [smem:[#allocation7 + $0x4]] (%p534_p4), %s476_s12  ;;  %s104_s23 = scalar_lea.sflag [#allocation3], %s103_s22 }
  0x21   : > { %s302_s13 = sshll.u32 %s121_s2, 26  ;;  %322 = sst [smem:[#allocation7 + $0x5]] (%p534_p4), %s477_s15 }
  0x22   : > { %s303_s17 = sadd.s32 134217728, %s302_s13  ;;  %s478_s24 = smov [#allocation6]  }
  0x23   : > { %323 = dma.general (%p534_p4), %s116_s27, 512, %s130_s30, %s104_s23, %s478_s24, [#allocation7], %s303_s17, 0  }
  0x24 PF: > { %p304_p13 = scmp.ge.s32.totalorder %s471_s11, 1  ;;  %p150_p0 = scmp.lt.s32.totalorder %s471_s11, 9 }
  0x26   : > { %p151_p1 = pnand %p304_p13, %p150_p0 }
  0x27   : > { %s580_s25 = sand.u32 (!%p151_p1), 1, %s455_s7  }
  0x28   : > { %154 = sbr.rel (%p151_p1) target bundleno = 75 (0x4b), region = 24  ;;  %s305_s26 = sshll.u32 (!%p151_p1), %s580_s25, 5 }
  0x29   : > { %s157_s28 = scalar_lea.sflag (!%p151_p1), [#allocation3], %s580_s25  ;;  %s160_s29 = scalar_lea.vmem (!%p151_p1), [#allocation2], %s305_s26 }
  0x2f   : > { %442 = dma.done.wait (%p540_p8), %s157_s28, 512  }
  0x30   : > { %444 = vsyncadd (%p540_p8), %s157_s28, 4294966784  ;;  %s178_s16 = scalar_lea.vmem [#allocation5], %s305_s26  ;;  %s315_s27 = sshll.u32 %s463_s9, 8  ;;  %v182_v0 = vld [vmem:[%s160_s29] sm:$0xff]  ;;  %v183_v1 = vld [vmem:[%s160_s29 + $0x10] sm:$0xff] }
  0x31   : > { %s208_s22 = sshll.u32 %s178_s16, 4  ;;  %s594_s3 = scalar_lea.hbm %s643_s1, %s315_s27  ;;  %v307_v2 = vld [vmem:[%s160_s29 + $0x8] sm:$0xff]  ;;  %184 = vst [vmem:[%s178_s16] sm:$0xff] %v182_v0  ;;  %185 = vst [vmem:[%s178_s16 + $0x10] sm:$0xff] %v183_v1  ;;  %v308_v3 = vld [vmem:[%s160_s29 + $0x18] sm:$0xff]  ;;  %s589_s22 = int_to_ptr.vmem [resolvable:$true] %s208_s22 }
  0x32   : > { %189 = vst [vmem:[%s178_s16 + $0x8] sm:$0xff] %v307_v2  ;;  %190 = vst [vmem:[%s178_s16 + $0x18] sm:$0xff] %v308_v3  ;;  %s192_s18 = scalar_lea.sflag [#allocation4], %s580_s25  ;;  %s389_s9 = scalar_lea.vmem %s589_s22, 512 }
  0x33   : > { %p390_p2 = scmp.ne.s32.totalorder %s589_s22, %s389_s9  ;;  %s479_s4 = smov [#allocation5]  }
  0x34   : > { %s393_s5 = sshll.u32 %s479_s4, 4  ;;  %s394_s5 = int_to_ptr.vmem [resolvable:$false] %s393_s5 }
  0x35   : > { %p391_p3 = pnand %p390_p2, %p544_p9  ;;  %s395_s12 = scalar_lea.vmem %s394_s5, 1024 }
  0x36   : > { %p396_p5 = scmp.lt.s32.totalorder %s589_s22, %s394_s5  ;;  %p397_p6 = scmp.lt.s32.totalorder %s395_s12, %s389_s9 }
  0x37   : > { %p392_p4 = pneg %p391_p3 }
  0x38   : > { %p398_p7 = por %p397_p6, %p396_p5 }
  0x3a   : > { %p399_p8 = pnand %p398_p7, %p392_p4 }
  0x3c   : > { %402 = shalt.err (!%p399_p8)
}
  0x3d   : > { %s403_s13 = scalar_lea.hbm %s594_s3, 512  ;;  %s407_s23 = scalar_lea.hbm %s643_s1, 4096 }
  0x3e   : > { %p404_p10 = scmp.ne.s32.totalorder %s594_s3, %s403_s13  ;;  %p408_p0 = scmp.lt.u32.totalorder %s594_s3, %s643_s1 }
  0x3f   : > { %p409_p1 = scmp.lt.u32.totalorder %s407_s23, %s403_s13  ;;  %p411_p3 = scmp.lt.u32.totalorder %s403_s13, %s594_s3 }
  0x40   : > { %p405_p12 = pnand %p404_p10, %p544_p9 }
  0x41   : > { %p410_p2 = por %p409_p1, %p408_p0 }
  0x42   : > { %p406_p13 = pneg %p405_p12 }
  0x43   : > { %p412_p4 = por %p411_p3, %p410_p2 }
  0x45   : > { %p413_p5 = pnand %p412_p4, %p406_p13 }
  0x47   : > { %416 = shalt.err (!%p413_p5)
}
  0x48   : > { %s480_s28 = smov 256   ;;  %s481_s29 = smov 2048  }
  0x49   : > { %s482_s16 = smov 16  }
  0x4a   : > { %325 = dma.vmem_to_hbm [thread:$0]  (%p544_p9), %s589_s22, 512, %s594_s3, %s192_s18, %s480_s28, %s481_s29, %s482_s16  }
  0x4b PF: > { %p331_p6 = scmp.ge.s32.totalorder %s471_s11, 2  ;;  %s223_s27 = sand.u32 1, %s451_s6  }
  0x4c   : > { %s224_s30 = scalar_lea.sflag [#allocation4], %s223_s27 }
  0x4d   : > { %p328_p7 = pnand %p331_p6, %p551_p11 }
  0x4f   : > { %446 = dma.done.wait (!%p328_p7), %s224_s30, 512  }
  0x50   : > { %448 = vsyncadd (!%p328_p7), %s224_s30, 4294966784  ;;  %s17_s11 = sadd.s32 1, %s471_s11   ;;  %s648_s6 = smov %s455_s7 }
  0x51   : > { %p14_p8 = scmp.ge.s32.totalorder %s17_s11, 10   ;;  %s649_s7 = smov %s459_s8 }
  0x52   : > { %s650_s8 = smov %s549_s20  ;;  %s651_s9 = smov %s467_s10 }
  0x53   : > { %s652_s10 = smov %s654_s14  ;;  %16 = sbr.rel (!%p14_p8) target bundleno = 6 (0x6), region = 75 }
  0x5a   :  { %229 = vsyncpa [#allocation3], 1 }
  0x5b   :  { %231 = vsyncpa [#allocation3 + $0x1], 1 }
  0x5c   :  { %232 = vsyncpa [#allocation4], 1 }
  0x5d   :  { %234 = vsyncpa [#allocation4 + $0x1], 1 }

</bundles_post_ra>
